<compile_context>
chip_gen: v6e
topology: v6e:2x2x1
jax: 0.10.0
libtpu: 0.0.40
codegen_flags: <defaults>
</compile_context>

<pallas_src>
import functools

import numpy as np
import jax
import jax.numpy as jnp
from jax.experimental import pallas as pl
from jax.experimental.pallas import tpu as pltpu


def _sinusoidal_kernel(t_ref, freqs_ref, out_ref, *, half_dim, dim):
    # t_ref:     (TB, 1)         float32   (timesteps for this batch tile)
    # freqs_ref: (1, half_dim)   float32   (resident across all grid steps)
    # out_ref:   (TB, dim)       float32
    angles = t_ref[...] * freqs_ref[...]                 # (TB, half_dim), broadcast
    out_ref[:, :half_dim] = jnp.sin(angles)              # direct slice store, no concat
    out_ref[:, half_dim:2 * half_dim] = jnp.cos(angles)
    if dim % 2 == 1:                                     # static branch (dim is static)
        out_ref[:, 2 * half_dim:] = jnp.zeros((t_ref.shape[0], 1), jnp.float32)


def sinusoidal_positional_embedding(t, dim, *, block_b=None):
    """JAX/Pallas equivalent of SinusoidalPositionalEmbedding(dim)(t)."""
    assert t.ndim == 1, "t is expected to be a 1-D tensor of timesteps"
    assert dim >= 4, "dim must be >= 4 (half_dim - 1 must be positive)"
    B = t.shape[0]
    half_dim = dim // 2

    # Trace-time constants: freqs baked once, not recomputed per grid step.
    exponent = -np.log(10000.0) / (half_dim - 1)
    freqs = jnp.exp(jnp.arange(half_dim, dtype=jnp.float32) * exponent)
    freqs = freqs.reshape(1, half_dim)

    t2 = t.astype(jnp.float32).reshape(B, 1)

    # Batch tile size: big enough to amortize per-step overhead, small enough
    # that 2x double-buffered (TB, dim) f32 tiles stay well under the scoped
    # VMEM limit on every generation (incl. v7x's 64 MiB physical VMEM).
    if block_b is None:
        if B <= 512:
            block_b = B                      # single / few tiles, full extent OK
        else:
            block_b = 512                    # multiple of 8 (sublane constraint)
    if block_b != B and block_b % 8 != 0:
        block_b = max(8, (block_b // 8) * 8)

    grid = (pl.cdiv(B, block_b),)

    kernel = functools.partial(_sinusoidal_kernel, half_dim=half_dim, dim=dim)
    return pl.pallas_call(
        kernel,
        out_shape=jax.ShapeDtypeStruct((B, dim), jnp.float32),
        grid=grid,
        in_specs=[
            pl.BlockSpec((block_b, 1), lambda i: (i, 0)),      # batch tile of t
            pl.BlockSpec((1, half_dim), lambda i: (0, 0)),     # freqs, resident
        ],
        out_specs=pl.BlockSpec((block_b, dim), lambda i: (i, 0)),
        compiler_params=pltpu.CompilerParams(
            dimension_semantics=("parallel",),                 # shard tiles across TCs
        ),
    )(t2, freqs)


def _reference(t, dim):
    """Pure-JAX reference mirroring the PyTorch forward."""
    half_dim = dim // 2
    exponent = -np.log(10000.0) / (half_dim - 1)
    freqs = jnp.exp(jnp.arange(half_dim, dtype=jnp.float32) * exponent)
    angles = t.astype(jnp.float32)[:, None] * freqs[None, :]
    emb = jnp.concatenate([jnp.sin(angles), jnp.cos(angles)], axis=-1)
    if dim % 2 == 1:
        emb = jnp.pad(emb, ((0, 0), (0, 1)))
    return emb


if __name__ == "__main__":
    key = jax.random.PRNGKey(0)
    batch = 16
    dim = 256  # keeps the output lane axis 128-dense; small enough for a demo

    # Timesteps (e.g. diffusion timesteps) as floats.
    t = jax.random.uniform(key, (batch,), dtype=jnp.float32,
                           minval=0.0, maxval=1000.0)

    out = sinusoidal_positional_embedding(t, dim)
    out = jax.block_until_ready(out)

    ref = _reference(t, dim)
    np.testing.assert_allclose(np.asarray(out), np.asarray(ref),
                               rtol=1e-5, atol=1e-5)
    assert out.shape == (batch, dim)

    # Also exercise the odd-dim zero-pad path (single tile, masked last column).
    dim_odd = 129
    out_odd = jax.block_until_ready(sinusoidal_positional_embedding(t, dim_odd))
    ref_odd = _reference(t, dim_odd)
    np.testing.assert_allclose(np.asarray(out_odd), np.asarray(ref_odd),
                               rtol=1e-5, atol=1e-5)
    assert out_odd.shape == (batch, dim_odd)

    print("KERNEL_OK")
</pallas_src>

<mosaic_0001>
module attributes {stable_mosaic.version = 11 : i64} {
  func.func @_sinusoidal_kernel(%arg0: i32, %arg1: memref<16x1xf32, #tpu.memory_space<vmem>>, %arg2: memref<1x128xf32, #tpu.memory_space<vmem>>, %arg3: memref<16x256xf32, #tpu.memory_space<vmem>>) attributes {dimension_semantics = [#tpu.dimension_semantics<parallel>], iteration_bounds = array<i64: 1>, scalar_prefetch = 0 : i64, scratch_operands = 0 : i64, tpu.core_type = #tpu.core_type<tc>, window_params = [{transform_indices = @transform_0, window_bounds = array<i64: 16, 1>}, {pipeline_mode = #tpu.pipeline_mode<synchronous>, transform_indices = @transform_1, window_bounds = array<i64: 1, 128>}, {transform_indices = @transform_2, window_bounds = array<i64: 16, 256>}]} {
    %c0 = arith.constant 0 : index
    %c0_0 = arith.constant 0 : index
    %0 = vector.load %arg1[%c0, %c0_0] : memref<16x1xf32, #tpu.memory_space<vmem>>, vector<16x1xf32>
    %c0_1 = arith.constant 0 : index
    %c0_2 = arith.constant 0 : index
    %1 = vector.load %arg2[%c0_1, %c0_2] : memref<1x128xf32, #tpu.memory_space<vmem>>, vector<1x128xf32>
    %2 = vector.broadcast %0 : vector<16x1xf32> to vector<16x128xf32>
    %3 = vector.broadcast %1 : vector<1x128xf32> to vector<16x128xf32>
    %4 = arith.mulf %2, %3 : vector<16x128xf32>
    %5 = math.sin %4 : vector<16x128xf32>
    %c0_3 = arith.constant 0 : index
    %c0_4 = arith.constant 0 : index
    %6 = vector.load %arg3[%c0_3, %c0_4] : memref<16x256xf32, #tpu.memory_space<vmem>>, vector<16x128xf32>
    tpu.vector_store %arg3[%c0_3, %c0_4], %5 {strides = array<i32>} : memref<16x256xf32, #tpu.memory_space<vmem>>, vector<16x128xf32>,
    %7 = math.cos %4 : vector<16x128xf32>
    %c0_5 = arith.constant 0 : index
    %c128 = arith.constant 128 : index
    %8 = vector.load %arg3[%c0_5, %c128] : memref<16x256xf32, #tpu.memory_space<vmem>>, vector<16x128xf32>
    tpu.vector_store %arg3[%c0_5, %c128], %7 {strides = array<i32>} : memref<16x256xf32, #tpu.memory_space<vmem>>, vector<16x128xf32>,
    return
  }
  func.func @transform_0(%arg0: i32) -> (i32, i32) {
    %c0_i32 = arith.constant 0 : i32
    %c0_i32_0 = arith.constant 0 : i32
    return %arg0, %c0_i32 : i32, i32
  }
  func.func @transform_1(%arg0: i32) -> (i32, i32) {
    %c0_i32 = arith.constant 0 : i32
    %c0_i32_0 = arith.constant 0 : i32
    %c0_i32_1 = arith.constant 0 : i32
    return %c0_i32, %c0_i32_0 : i32, i32
  }
  func.func @transform_2(%arg0: i32) -> (i32, i32) {
    %c0_i32 = arith.constant 0 : i32
    %c0_i32_0 = arith.constant 0 : i32
    return %arg0, %c0_i32 : i32, i32
  }
}

</mosaic_0001>

<bundles_post_ra>
// kernel: tpu_custom_call.1
= control target key start
LH: loop header
LB: loop body
LE: loop exit
PB: predicated region body
PF: predicated region fallthrough
CT: control target
= control target key end

     0   :  { %v533_v1 = vmov 0   ;;  %s630_s0 = inlined_call_operand.vmem [shape: f32[16,1], index: 0, kind: input, shape index: {}]   ;;  %s631_s1 = inlined_call_operand.vmem [shape: f32[1,128], index: 1, kind: input, shape index: {}]   ;;  %s632_s2 = inlined_call_operand.hbm [shape: f32[16,256], index: 2, kind: output, shape index: {}]  }
   0x1   :  { %v12_v0 = vld [vmem:[%s630_s0] sm:$0xff]  ;;  %502 = vset.pattern.permute.xlu0 %v533_v1  ;;  %v13_v2 = vld [vmem:[%s630_s0 + $0x8] sm:$0xff] }
   0x2   :  { %17 = vperm.xlu0 %502, %v12_v0  }
   0x3   :  { %7 = vsyncpa [#allocation3], 0  ;;  %v467_v3 = vld [vmem:[%s631_s1] ss:$0 sm:$0xff]  ;;  %v534_v24 = vmov 683565275  }
   0x4   :  { %v535_v28 = vmov 2475754826   ;;  %v536_v30 = vmov 2131351028   ;;  %v537_v32 = vmov 2102212464  }
   0x5   :  { %v538_v34 = vmov 920167782   ;;  %v539_v41 = vmov 1326507024   ;;  %s540_s0 = smov [#allocation2]  }
   0x6   :  { %22 = vperm.xlu0 %502, %v13_v2   ;;  %s456_s1 = sshll.u32 %s540_s0, 4  ;;  %s457_s1 = int_to_ptr.vmem [resolvable:$true] %s456_s1 }
   0x7   :  { %s511_s15 = scalar_lea.vmem %s457_s1, 512  ;;  %p516_p1 = scmp.lt.s32.totalorder %s457_s1, %s457_s1 }
   0x8   :  { %p512_p0 = scmp.ne.s32.totalorder %s457_s1, %s511_s15  ;;  %p517_p2 = scmp.lt.s32.totalorder %s511_s15, %s511_s15 }
   0xa   :  { %p518_p3 = por %p517_p2, %p516_p1 }
   0xc   :  { %p519_p4 = pnand %p518_p3, %p512_p0 }
  0x7d   :  { %v18_v4 = vpop.permute.xlu0 %17 }
  0x7e   :  { %v567_v5 = vmul.f32 %v467_v3, %v18_v4 }
  0x80   :  { %v33_v6 = vand.u32 2147483647, %v567_v5  ;;  %v36_v7 = vand.u32 2139095040, %v567_v5  ;;  %vm35_vm14 = vcmp.lt.s32.totalorder %v567_v5, 0 }
  0x81   :  { %v23_v8 = vpop.permute.xlu0 %22 }
  0x82   :  { %v37_v9 = vshrl.u32 %v36_v7, 23  ;;  %v571_v10 = vmul.f32 %v467_v3, %v23_v8  ;;  %v40_v11 = vand.u32 8388607, %v33_v6  ;;  %vm34_vm15 = vcmp.le.f32.partialorder %v33_v6, 0.7853982 }
  0x84   :  { %v468_v12 = vadd.s32 4294967169, %v37_v9  ;;  %v140_v13 = vand.u32 2139095040, %v571_v10  ;;  %v41_v15 = vor.u32 8388608, %v40_v11  ;;  %v137_v17 = vand.u32 2147483647, %v571_v10 }
  0x86   :  { %v43_v14 = vadd.s32 1, %v468_v12  ;;  %v141_v16 = vshrl.u32 %v140_v13, 23  ;;  %v577_v22 = vshll.u32 %v41_v15, 8  ;;  %v144_v26 = vand.u32 8388607, %v137_v17 }
  0x88   :  { %vm44_vm0 = vcmp.gt.s32.totalorder %v43_v14, 0  ;;  %v472_v19 = vadd.s32 4294967169, %v141_v16  ;;  %v145_v56 = vor.u32 8388608, %v144_v26 }
  0x89   :  { %v45_v18 = vsel %vm44_vm0, %v43_v14, 0  ;;  %vm139_vm0 = vcmp.lt.s32.totalorder %v571_v10, 0 }
  0x8a   :  { %v46_v20 = vshrl.u32 %v45_v18, 5  ;;  %v47_v21 = vand.u32 31, %v45_v18  ;;  %v147_v27 = vadd.s32 1, %v472_v19  ;;  %v185_v7 = vshll.u32 %v145_v56, 8 }
  0x8c   :  { %v48_v23 = vsub.s32 32, %v47_v21  ;;  %v50_v25 = vshll.u32 %v534_v24, %v47_v21  ;;  %v53_v29 = vshll.u32 %v535_v28, %v47_v21  ;;  %v56_v31 = vshll.u32 %v536_v30, %v47_v21 }
  0x8d   :  { %v59_v33 = vshll.u32 %v537_v32, %v47_v21  ;;  %v62_v35 = vshll.u32 %v538_v34, %v47_v21  ;;  %vm65_vm1 = vcmp.lt.s32.totalorder %v46_v20, 1  ;;  %vm67_vm2 = vcmp.lt.s32.totalorder %v46_v20, 3 }
  0x8e   :  { %v51_v36 = vshrl.u32 %v535_v28, %v48_v23  ;;  %v54_v37 = vshrl.u32 %v536_v30, %v48_v23  ;;  %v57_v38 = vshrl.u32 %v537_v32, %v48_v23  ;;  %v49_v39 = vshrl.u32 %v534_v24, %v48_v23 }
  0x8f   :  { %v60_v40 = vshrl.u32 %v538_v34, %v48_v23  ;;  %v63_v42 = vshrl.u32 %v539_v41, %v48_v23  ;;  %vm148_vm3 = vcmp.gt.s32.totalorder %v147_v27, 0  ;;  %vm68_vm4 = vcmp.lt.s32.totalorder %v46_v20, 4 }
  0x90   :  { %v52_v43 = vor.u32 %v51_v36, %v50_v25  ;;  %v55_v44 = vor.u32 %v54_v37, %v53_v29  ;;  %v58_v45 = vor.u32 %v57_v38, %v56_v31  ;;  %v149_v48 = vsel %vm148_vm3, %v147_v27, 0 }
  0x91   :  { %v61_v46 = vor.u32 %v60_v40, %v59_v33  ;;  %v64_v47 = vor.u32 %v63_v42, %v62_v35  ;;  %vm66_vm5 = vcmp.lt.s32.totalorder %v46_v20, 2  ;;  %v151_v59 = vand.u32 31, %v149_v48 }
  0x92   :  { %v69_v49 = vsel %vm65_vm1, %v49_v39, %v52_v43  ;;  %v70_v50 = vsel %vm68_vm4, %v58_v45, 2102212464  ;;  %v73_v51 = vsel %vm65_vm1, %v52_v43, %v55_v44  ;;  %v77_v52 = vsel %vm65_vm1, %v55_v44, %v58_v45 }
  0x93   :  { %v71_v53 = vsel %vm67_vm2, %v55_v44, %v70_v50  ;;  %v74_v54 = vsel %vm68_vm4, %v61_v46, 920167782  ;;  %v78_v55 = vsel %vm68_vm4, %v64_v47, 1326507024  ;;  %v150_v3 = vshrl.u32 %v149_v48, 5 }
  0x94   :  { %v75_v57 = vsel %vm67_vm2, %v58_v45, %v74_v54  ;;  %v79_v58 = vsel %vm67_vm2, %v61_v46, %v78_v55  ;;  %v72_v60 = vsel %vm66_vm5, %v69_v49, %v71_v53  ;;  %v152_v4 = vsub.s32 32, %v151_v59 }
  0x95   :  { %v76_v61 = vsel %vm66_vm5, %v73_v51, %v75_v57  ;;  %v80_v62 = vsel %vm66_vm5, %v77_v52, %v79_v58  ;;  %v88_v8 = vmul.u32 %v577_v22, %v72_v60  ;;  %v154_v9 = vshll.u32 %v534_v24, %v151_v59 }
  0x96   :  { %v590_v63 = vmul.u32.u64.low %v577_v22, %v80_v62  ;;  %v591_v0 = vmul.u32.u64.high %v577_v22, %v80_v62, %v590_v63  ;;  %v594_v1 = vmul.u32.u64.low %v577_v22, %v76_v61  ;;  %v595_v2 = vmul.u32.u64.high %v577_v22, %v76_v61, %v594_v1 }
  0x97   :  { %v157_v11 = vshll.u32 %v535_v28, %v151_v59  ;;  %v160_v12 = vshll.u32 %v536_v30, %v151_v59  ;;  %v155_v13 = vshrl.u32 %v535_v28, %v152_v4  ;;  %v158_v14 = vshrl.u32 %v536_v30, %v152_v4 }
  0x98   :  { %v161_v15 = vshrl.u32 %v537_v32, %v152_v4  ;;  %v163_v16 = vshll.u32 %v537_v32, %v151_v59  ;;  %vm90_vm6 = vc.u32 %v591_v0, %v594_v1  ;;  %v91_v18 = vadd.s32 1, %v595_v2 }
  0x99   :  { %v164_v19 = vshrl.u32 %v538_v34, %v152_v4  ;;  %v166_v20 = vshll.u32 %v538_v34, %v151_v59  ;;  %v156_v21 = vor.u32 %v155_v13, %v154_v9  ;;  %v159_v23 = vor.u32 %v158_v14, %v157_v11 }
  0x9a   :  { %v162_v25 = vor.u32 %v161_v15, %v160_v12  ;;  %v167_v26 = vshrl.u32 %v539_v41, %v152_v4  ;;  %v92_v22 = vsel %vm90_vm6, %v91_v18, %v595_v2  ;;  %vm169_vm7 = vcmp.lt.s32.totalorder %v150_v3, 1 }
  0x9b   :  { %v165_v27 = vor.u32 %v164_v19, %v163_v16  ;;  %vm172_vm8 = vcmp.lt.s32.totalorder %v150_v3, 4  ;;  %v93_v28 = vadd.s32 %v92_v22, %v88_v8  ;;  %vm171_vm9 = vcmp.lt.s32.totalorder %v150_v3, 3 }
  0x9c   :  { %v168_v29 = vor.u32 %v167_v26, %v166_v20  ;;  %v174_v30 = vsel %vm172_vm8, %v162_v25, 2102212464  ;;  %v153_v31 = vshrl.u32 %v534_v24, %v152_v4  ;;  %v177_v32 = vsel %vm169_vm7, %v156_v21, %v159_v23 }
  0x9d   :  { %v178_v33 = vsel %vm172_vm8, %v165_v27, 920167782  ;;  %v181_v35 = vsel %vm169_vm7, %v159_v23, %v162_v25  ;;  %v94_v36 = vadd.s32 536870912, %v93_v28  ;;  %vm170_vm10 = vcmp.lt.s32.totalorder %v150_v3, 2 }
  0x9e   :  { %v179_v34 = vsel %vm171_vm9, %v162_v25, %v178_v33  ;;  %v182_v37 = vsel %vm172_vm8, %v168_v29, 1326507024  ;;  %v173_v38 = vsel %vm169_vm7, %v153_v31, %v156_v21  ;;  %v175_v39 = vsel %vm171_vm9, %v159_v23, %v174_v30 }
  0x9f   :  { %v180_v40 = vsel %vm170_vm10, %v177_v32, %v179_v34  ;;  %v183_v41 = vsel %vm171_vm9, %v165_v27, %v182_v37  ;;  %v95_v42 = vshrl.u32 %v94_v36, 30  ;;  %v176_v48 = vsel %vm170_vm10, %v173_v38, %v175_v39 }
  0xa0   :  { %v184_v43 = vsel %vm170_vm10, %v181_v35, %v183_v41  ;;  %v605_v44 = vmul.u32.u64.low %v185_v7, %v180_v40  ;;  %v606_v45 = vmul.u32.u64.high %v185_v7, %v180_v40, %v605_v44  ;;  %v192_v51 = vmul.u32 %v185_v7, %v176_v48 }
  0xa1   :  { %v608_v46 = vmul.u32.u64.low %v185_v7, %v184_v43  ;;  %v609_v47 = vmul.u32.u64.high %v185_v7, %v184_v43, %v608_v46  ;;  %v96_v24 = vshll.u32 %v95_v42, 30  ;;  %v89_v63 = vadd.s32 %v594_v1, %v591_v0 }
  0xa2   :  { %v195_v50 = vadd.s32 1, %v606_v45  ;;  %v119_v26 = vsub.s32 4, %v95_v42  ;;  %vm138_vm1 = vcmp.le.f32.partialorder %v137_v17, 0.7853982  ;;  %vm125_vm8 = vweird.f32 %v567_v5 }
  0xa3   :  { %v97_v49 = vsub.s32 %v93_v28, %v96_v24  ;;  %vm194_vm11 = vc.u32 %v609_v47, %v605_v44  ;;  %v193_v23 = vadd.s32 %v605_v44, %v609_v47 }
  0xa4   :  { %v196_v53 = vsel %vm194_vm11, %v195_v50, %v606_v45  ;;  %v120_v33 = vsel %vm35_vm14, %v119_v26, %v95_v42 }
  0xa5   :  { %v99_v52 = vsub.s32 0, %v97_v49  ;;  %v197_v54 = vadd.s32 %v196_v53, %v192_v51  ;;  %v122_v37 = vsel %vm34_vm15, 0, %v120_v33 }
  0xa6   :  { %v126_v39 = vadd.s32 3, %v122_v37  ;;  %v336_v45 = vand.u32 3, %v122_v37 }
  0xa7   :  { %v469_v55 = vmin.u32 %v99_v52, %v97_v49  ;;  %v198_v56 = vadd.s32 536870912, %v197_v54 }
  0xa8   :  { %v127_v44 = vand.u32 3, %v126_v39  ;;  %vm341_vm3 = vcmp.eq.s32.totalorder %v336_v45, 2  ;;  %vm338_vm5 = vcmp.eq.s32.totalorder %v336_v45, 0  ;;  %vm337_vm7 = vcmp.lt.s32.totalorder %v336_v45, 2 }
  0xa9   :  { %v101_v57 = vclz %v469_v55  ;;  %v199_v58 = vshrl.u32 %v198_v56, 30 }
  0xaa   :  { %vm132_vm2 = vcmp.eq.s32.totalorder %v127_v44, 2  ;;  %vm129_vm4 = vcmp.eq.s32.totalorder %v127_v44, 0  ;;  %vm128_vm6 = vcmp.lt.s32.totalorder %v127_v44, 2 }
  0xab   :  { %v470_v59 = vadd.s32 4294967294, %v101_v57  ;;  %v200_v60 = vshll.u32 %v199_v58, 30  ;;  %v223_v41 = vsub.s32 4, %v199_v58 }
  0xad   :  { %vm471_vm12 = vcmp.lt.s32.totalorder %v470_v59, 0  ;;  %v201_v62 = vsub.s32 %v197_v54, %v200_v60  ;;  %v224_v42 = vsel %vm139_vm0, %v223_v41, %v199_v58 }
  0xae   :  { %v104_v61 = vsel %vm471_vm12, 0, %v470_v59 }
  0xaf   :  { %v105_v2 = vsub.s32 32, %v104_v61  ;;  %v109_v3 = vsub.s32 4294967266, %v104_v61  ;;  %v203_v4 = vsub.s32 0, %v201_v62  ;;  %v106_v7 = vshll.u32 %v97_v49, %v104_v61 }
  0xb0   :  { %v226_v49 = vsel %vm138_vm1, 0, %v224_v42 }
  0xb1   :  { %v107_v8 = vshrl.u32 %v89_v63, %v105_v2  ;;  %v110_v9 = vadd.s32 127, %v109_v3  ;;  %v473_v11 = vmin.u32 %v203_v4, %v201_v62  ;;  %v230_v55 = vadd.s32 3, %v226_v49 }
  0xb2   :  { %v439_v59 = vand.u32 3, %v226_v49 }
  0xb3   :  { %v108_v12 = vor.u32 %v107_v8, %v106_v7  ;;  %v111_v13 = vshll.u32 %v110_v9, 23  ;;  %v205_v14 = vclz %v473_v11  ;;  %v231_v58 = vand.u32 3, %v230_v55 }
  0xb4   :  { %vm444_vm10 = vcmp.eq.s32.totalorder %v439_v59, 2  ;;  %vm441_vm12 = vcmp.eq.s32.totalorder %v439_v59, 0 }
  0xb5   :  { %v112_v15 = vor.u32 4788187, %v111_v13  ;;  %v474_v16 = vadd.s32 4294967294, %v205_v14  ;;  %v115_v19 = vcvt.s32.f32 %v108_v12  ;;  %vm236_vm9 = vcmp.eq.s32.totalorder %v231_v58, 2 }
  0xb6   :  { %vm233_vm11 = vcmp.eq.s32.totalorder %v231_v58, 0 }
  0xb7   :  { %v113_v18 = vand.u32 2147483647, %v112_v15  ;;  %vm475_vm13 = vcmp.lt.s32.totalorder %v474_v16, 0 }
  0xb8   :  { %v208_v21 = vsel %vm475_vm13, 0, %v474_v16  ;;  %vm232_vm13 = vcmp.lt.s32.totalorder %v231_v58, 2 }
  0xb9   :  { %v116_v20 = vmul.f32 %v115_v19, %v113_v18  ;;  %v209_v0 = vsub.s32 32, %v208_v21  ;;  %v213_v1 = vsub.s32 4294967266, %v208_v21  ;;  %v210_v22 = vshll.u32 %v201_v62, %v208_v21 }
  0xbb   :  { %v117_v25 = vxor.u32 2147483648, %v116_v20  ;;  %v211_v27 = vshrl.u32 %v193_v23, %v209_v0  ;;  %v214_v28 = vadd.s32 127, %v213_v1 }
  0xbd   :  { %v118_v29 = vsel %vm35_vm14, %v117_v25, %v116_v20  ;;  %v212_v31 = vor.u32 %v211_v27, %v210_v22  ;;  %v215_v32 = vshll.u32 %v214_v28, 23  ;;  %vm440_vm14 = vcmp.lt.s32.totalorder %v439_v59, 2 }
  0xbe   :  { %v121_v30 = vsel %vm34_vm15, %v567_v5, %v118_v29  ;;  %vm229_vm15 = vweird.f32 %v571_v10 }
  0xbf   :  { %503 = vcosq.f32 %v121_v30  ;;  %v216_v35 = vor.u32 4788187, %v215_v32  ;;  %v219_v34 = vcvt.s32.f32 %v212_v31 }
  0xc0   :  { %505 = vsinq.f32 %v121_v30 }
  0xc1   :  { %v217_v36 = vand.u32 2147483647, %v216_v35 }
  0xc3   :  { %v220_v38 = vmul.f32 %v219_v34, %v217_v36 }
  0xc5   :  { %v221_v40 = vxor.u32 2147483648, %v220_v38 }
  0xc7   :  { %v222_v6 = vsel %vm139_vm0, %v221_v40, %v220_v38 }
  0xc8   :  { %v225_v43 = vsel %vm138_vm1, %v571_v10, %v222_v6 }
  0xc9   :  { %507 = vcosq.f32 %v225_v43 }
  0xca   :  { %509 = vsinq.f32 %v225_v43 }
  0xcc   :  { %v504_v46 = vpop.eup %503 }
  0xcd   :  { %v506_v47 = vpop.eup %505  ;;  %v133_v24 = vxor.u32 2147483648, %v504_v46 }
  0xce   :  { %v130_v48 = vxor.u32 2147483648, %v506_v47 }
  0xcf   :  { %v134_v50 = vsel %vm132_vm2, %v133_v24, %v506_v47  ;;  %v343_v51 = vsel %vm341_vm3, %v133_v24, %v506_v47 }
  0xd0   :  { %v131_v17 = vsel %vm129_vm4, %v504_v46, %v130_v48  ;;  %v340_v52 = vsel %vm338_vm5, %v504_v46, %v130_v48 }
  0xd1   :  { %v135_v53 = vsel %vm128_vm6, %v131_v17, %v134_v50  ;;  %v344_v54 = vsel %vm337_vm7, %v340_v52, %v343_v51 }
  0xd2   :  { %v136_v56 = vsel %vm125_vm8, nan, %v135_v53  ;;  %v345_v57 = vsel %vm125_vm8, nan, %v344_v54 }
  0xd3   :  { %241 = vst [vmem:[#allocation2] sm:$0xff] %v136_v56  ;;  %449 = vst [vmem:[#allocation2 + $0x8] sm:$0xff] %v345_v57 }
  0xd6   :  { %v508_v60 = vpop.eup %507 }
  0xd7   :  { %v510_v61 = vpop.eup %509  ;;  %v237_v62 = vxor.u32 2147483648, %v508_v60 }
  0xd8   :  { %v234_v63 = vxor.u32 2147483648, %v510_v61 }
  0xd9   :  { %v238_v2 = vsel %vm236_vm9, %v237_v62, %v510_v61  ;;  %v446_v5 = vsel %vm444_vm10, %v237_v62, %v510_v61 }
  0xda   :  { %v235_v3 = vsel %vm233_vm11, %v508_v60, %v234_v63  ;;  %v443_v4 = vsel %vm441_vm12, %v508_v60, %v234_v63 }
  0xdb   :  { %v239_v7 = vsel %vm232_vm13, %v235_v3, %v238_v2  ;;  %v447_v8 = vsel %vm440_vm14, %v443_v4, %v446_v5 }
  0xdc   :  { %v240_v9 = vsel %vm229_vm15, nan, %v239_v7  ;;  %v448_v11 = vsel %vm229_vm15, nan, %v447_v8 }
  0xdd   :  { %242 = vst [vmem:[#allocation2 + $0x10] sm:$0xff] %v240_v9  ;;  %450 = vst [vmem:[#allocation2 + $0x18] sm:$0xff] %v448_v11 }
  0xde   :  { %522 = shalt.err (!%p519_p4)
}
  0xdf   :  { %s541_s16 = smov 256   ;;  %s542_s17 = smov 16  }
  0xe0   :  { %462 = dma.vmem_to_hbm [thread:$0]  %s457_s1, 512, %s632_s2, [#allocation3], %s541_s16, %s541_s16, %s542_s17  }
  0xe1   :  { %531 = dma.done.wait [#allocation3], 512  }
  0xe2   :  { %532 = vsyncadd [#allocation3], 4294966784 }
  0xe3   :  { %466 = vsyncpa [#allocation3], 1 }

</bundles_post_ra>
